<compile_context>
chip_gen: v6e
topology: v6e:2x2x1
jax: 0.10.0
libtpu: 0.0.40
codegen_flags: <defaults>
</compile_context>

<pallas_src>
import jax
import jax.numpy as jnp
from jax.experimental import pallas as pl
from jax.experimental.pallas import tpu as pltpu


def _round_up(n, m):
    return ((n + m - 1) // m) * m


def _vmem_cap_bytes():
    """Per-generation scoped-VMEM cap (advisory; conservative fallback)."""
    try:
        kind = jax.devices()[0].device_kind.lower()
    except Exception:
        kind = ""
    if "v7" in kind:
        return 48 << 20      # v7x: 64 MiB physical per TensorCore
    return 100 << 20         # v5e / v6e: 128 MiB physical


# ----------------------------------------------------------------------------
# Stage 1: build W = P @ (L*mask + I) @ (U*mask + diag(sign_S * exp(log_S)))
# Runs once per parameter set (single grid point, D x D is tiny).  Emits W
# directly in the compute dtype so Stage 2 reads it as-is.
# ----------------------------------------------------------------------------
def _build_w_kernel(p_ref, l_ref, u_ref, sign_ref, logs_ref, w_ref):
    D = l_ref.shape[0]
    row = jax.lax.broadcasted_iota(jnp.int32, (D, D), 0)
    col = jax.lax.broadcasted_iota(jnp.int32, (D, D), 1)
    eye = (row == col).astype(jnp.float32)
    l_mask = (row > col).astype(jnp.float32)   # strictly lower triangular
    u_mask = (row < col).astype(jnp.float32)   # strictly upper triangular

    L_eff = l_ref[...] * l_mask + eye
    s_diag = sign_ref[...] * jnp.exp(logs_ref[...])          # (1, D)
    U_eff = u_ref[...] * u_mask + eye * s_diag               # diag(sign*exp(logS))

    # Match reference association: (P @ L_eff) @ U_eff.
    # (If bit-faithful parity with the f32 reference is required, these two tiny
    #  products could be done with precision=HIGHEST in plain XLA instead.)
    PL = jnp.dot(p_ref[...], L_eff, preferred_element_type=jnp.float32)
    W = jnp.dot(PL, U_eff, preferred_element_type=jnp.float32)
    w_ref[...] = W.astype(w_ref.dtype)


# ----------------------------------------------------------------------------
# Stage 2: batch-tiled  out = x @ W + b   (f32 accumulation, cast on store)
# ----------------------------------------------------------------------------
def _matmul_bias_kernel(x_ref, w_ref, b_ref, out_ref):
    # In-register cast of the x tile to the compute dtype (no extra HBM pass).
    x = x_ref[...].astype(w_ref.dtype)
    acc = jnp.dot(x, w_ref[...], preferred_element_type=jnp.float32)
    out_ref[...] = (acc + b_ref[...]).astype(out_ref.dtype)


def lu_invertible_mm_direct(x, b, P, L, U, sign_S, log_S,
                            *, tile_b=2048,
                            compute_dtype=jnp.float32,
                            out_dtype=None):
    """Direct-mode forward of LUInvertibleMM. Returns (outputs, logdet)."""
    B, D = x.shape
    out_dtype = jnp.dtype(x.dtype) if out_dtype is None else jnp.dtype(out_dtype)
    compute_dtype = jnp.dtype(compute_dtype)

    vmem = pl.BlockSpec(memory_space=pltpu.MemorySpace.VMEM)

    # ---- Stage 1: build W once (Pallas, single grid point), in compute dtype. ----
    W = pl.pallas_call(
        _build_w_kernel,
        out_shape=jax.ShapeDtypeStruct((D, D), compute_dtype),
        in_specs=[vmem] * 5,
        out_specs=vmem,
    )(P, L, U, sign_S.reshape(1, D), log_S.reshape(1, D))

    b_row = b.astype(jnp.float32).reshape(1, D)   # added in f32 after accumulation

    # ---- Stage 2: tiled GEMM over the batch dimension. ----
    # Sublane packing: 2-byte dtypes pack 16 rows per vreg, 4-byte pack 8.
    min_itemsize = min(jnp.dtype(x.dtype).itemsize,
                       compute_dtype.itemsize, out_dtype.itemsize)
    align = 32 // min_itemsize

    if B <= align:
        tile_b = B                                   # full dim: always legal
    elif B <= tile_b:
        # Ensure >= 2 grid steps so v7x's 2 TensorCores both get work.
        half = _round_up(pl.cdiv(B, 2), align)
        tile_b = min(_round_up(B, align), half)
    else:
        tile_b = max(align, (tile_b // align) * align)
    grid = (pl.cdiv(B, tile_b),)

    x_bytes = jnp.dtype(x.dtype).itemsize
    c_bytes = compute_dtype.itemsize
    o_bytes = out_dtype.itemsize
    # Double-buffered x/out tiles; W and bias have constant index maps but are
    # still pipeline inputs, so account their buffers twice.  Headroom added.
    vmem_bytes = (2 * tile_b * D * (x_bytes + o_bytes)
                  + 2 * D * D * c_bytes
                  + 2 * D * 4
                  + (2 << 20))
    vmem_limit = int(min(max(vmem_bytes, 8 << 20), _vmem_cap_bytes()))
    # TODO(synk): for very large D (resident W ~>32 MiB) add K/N tiling with an
    # f32 accumulator scratch (init/finalize via pl.when, K axis 'arbitrary').

    cost = pl.CostEstimate(
        flops=2 * B * D * D,
        transcendentals=0,
        bytes_accessed=B * D * (x_bytes + o_bytes) + D * D * c_bytes + D * 4,
    )

    out = pl.pallas_call(
        _matmul_bias_kernel,
        out_shape=jax.ShapeDtypeStruct((B, D), out_dtype),
        grid=grid,
        in_specs=[
            pl.BlockSpec((tile_b, D), lambda i: (i, 0)),   # x tile (pipelined)
            pl.BlockSpec((D, D), lambda i: (0, 0)),        # W (resident)
            pl.BlockSpec((1, D), lambda i: (0, 0)),        # bias (resident)
        ],
        out_specs=pl.BlockSpec((tile_b, D), lambda i: (i, 0)),
        compiler_params=pltpu.CompilerParams(
            dimension_semantics=("parallel",),             # megacore on v7x
            vmem_limit_bytes=vmem_limit,
        ),
        cost_estimate=cost,
    )(x, W, b_row)

    # logdet = sum(log_S): parameter-only scalar -> computed outside the kernel.
    logdet = jnp.sum(log_S) * jnp.ones((B, 1), jnp.float32)
    return out, logdet


# ----------------------------------------------------------------------------
# Pure-JAX reference (mirrors the PyTorch module, mode='direct').
# ----------------------------------------------------------------------------
def _reference(x, b, P, L, U, sign_S, log_S):
    D = L.shape[0]
    eye = jnp.eye(D, dtype=jnp.float32)
    l_mask = jnp.tril(jnp.ones((D, D), jnp.float32), -1)
    u_mask = l_mask.T
    L_eff = L * l_mask + eye
    U_eff = U * u_mask + jnp.diag(sign_S * jnp.exp(log_S))
    W = P @ L_eff @ U_eff
    out = x.astype(jnp.float32) @ W + b
    logd = jnp.sum(log_S) * jnp.ones((x.shape[0], 1), jnp.float32)
    return out, logd


if __name__ == "__main__":
    key = jax.random.PRNGKey(0)
    B, D = 256, 32   # batch, num_inputs (small demo)

    k_w, k_b, k_x = jax.random.split(key, 3)

    # Glow-style deterministic init: random orthogonal W0, small bias.
    W0 = jnp.linalg.qr(jax.random.normal(k_w, (D, D), dtype=jnp.float32))[0]
    b = 0.01 * jax.random.normal(k_b, (D,), dtype=jnp.float32)

    # LU factorization (done once, like the module's __init__).
    P, L, U = jax.scipy.linalg.lu(W0)
    S = jnp.diag(U)
    sign_S = jnp.sign(S)
    log_S = jnp.log(jnp.abs(S))

    x = jax.random.normal(k_x, (B, D), dtype=jnp.float32)
    ref_out, ref_logdet = _reference(x, b, P, L, U, sign_S, log_S)

    # f32 path, default tile clamp (B=256 -> 2 grid steps of 128 rows).
    out, logdet = lu_invertible_mm_direct(x, b, P, L, U, sign_S, log_S)
    out = jax.block_until_ready(out)
    logdet = jax.block_until_ready(logdet)
    assert out.shape == (B, D) and out.dtype == jnp.float32
    assert logdet.shape == (B, 1)
    assert jnp.allclose(out, ref_out, atol=1e-4, rtol=1e-4)
    assert jnp.allclose(logdet, ref_logdet, atol=1e-5, rtol=1e-5)

    # Explicit smaller tile to exercise a longer grid (4 steps of 64 rows).
    out64, _ = lu_invertible_mm_direct(x, b, P, L, U, sign_S, log_S, tile_b=64)
    out64 = jax.block_until_ready(out64)
    assert jnp.allclose(out64, ref_out, atol=1e-4, rtol=1e-4)

    # bf16 compute + bf16 output store (f32 MXU accumulation, cast on store;
    # x stays f32 in HBM and is cast in-register inside the kernel).
    out_bf16, _ = lu_invertible_mm_direct(
        x, b, P, L, U, sign_S, log_S,
        compute_dtype=jnp.bfloat16, out_dtype=jnp.bfloat16)
    out_bf16 = jax.block_until_ready(out_bf16)
    assert out_bf16.dtype == jnp.bfloat16
    assert jnp.allclose(out_bf16.astype(jnp.float32), ref_out, atol=2e-1, rtol=5e-2)

    # TODO(synk): inverse mode ((x - b) @ inverse(W)) not implemented — dense
    # matrix inversion has no clean Pallas TPU primitive.
    print("KERNEL_OK")
</pallas_src>

<mosaic_0001>
module attributes {stable_mosaic.version = 11 : i64} {
  func.func @_build_w_kernel(%arg0: memref<32x32xf32, #tpu.memory_space<vmem>>, %arg1: memref<32x32xf32, #tpu.memory_space<vmem>>, %arg2: memref<32x32xf32, #tpu.memory_space<vmem>>, %arg3: memref<1x32xf32, #tpu.memory_space<vmem>>, %arg4: memref<1x32xf32, #tpu.memory_space<vmem>>, %arg5: memref<32x32xf32, #tpu.memory_space<vmem>>) attributes {dimension_semantics = [], scalar_prefetch = 0 : i64, scratch_operands = 0 : i64, tpu.core_type = #tpu.core_type<tc>} {
    %0 = tpu.iota {dimensions = array<i32: 0>} : vector<32x32xi32>
    %1 = tpu.iota {dimensions = array<i32: 1>} : vector<32x32xi32>
    %2 = arith.cmpi eq, %0, %1 : vector<32x32xi32>
    %3 = arith.extui %2 : vector<32x32xi1> to vector<32x32xi32>
    %4 = arith.sitofp %3 : vector<32x32xi32> to vector<32x32xf32>
    %5 = arith.cmpi sgt, %0, %1 : vector<32x32xi32>
    %6 = arith.extui %5 : vector<32x32xi1> to vector<32x32xi32>
    %7 = arith.sitofp %6 : vector<32x32xi32> to vector<32x32xf32>
    %8 = arith.cmpi slt, %0, %1 : vector<32x32xi32>
    %9 = arith.extui %8 : vector<32x32xi1> to vector<32x32xi32>
    %10 = arith.sitofp %9 : vector<32x32xi32> to vector<32x32xf32>
    %c0 = arith.constant 0 : index
    %c0_0 = arith.constant 0 : index
    %11 = vector.load %arg1[%c0, %c0_0] : memref<32x32xf32, #tpu.memory_space<vmem>>, vector<32x32xf32>
    %12 = arith.mulf %11, %7 : vector<32x32xf32>
    %13 = arith.addf %12, %4 : vector<32x32xf32>
    %c0_1 = arith.constant 0 : index
    %c0_2 = arith.constant 0 : index
    %14 = vector.load %arg3[%c0_1, %c0_2] : memref<1x32xf32, #tpu.memory_space<vmem>>, vector<1x32xf32>
    %c0_3 = arith.constant 0 : index
    %c0_4 = arith.constant 0 : index
    %15 = vector.load %arg4[%c0_3, %c0_4] : memref<1x32xf32, #tpu.memory_space<vmem>>, vector<1x32xf32>
    %16 = math.exp %15 : vector<1x32xf32>
    %17 = arith.mulf %14, %16 : vector<1x32xf32>
    %c0_5 = arith.constant 0 : index
    %c0_6 = arith.constant 0 : index
    %18 = vector.load %arg2[%c0_5, %c0_6] : memref<32x32xf32, #tpu.memory_space<vmem>>, vector<32x32xf32>
    %19 = arith.mulf %18, %10 : vector<32x32xf32>
    %20 = vector.broadcast %17 : vector<1x32xf32> to vector<32x32xf32>
    %21 = arith.mulf %4, %20 : vector<32x32xf32>
    %22 = arith.addf %19, %21 : vector<32x32xf32>
    %c0_7 = arith.constant 0 : index
    %c0_8 = arith.constant 0 : index
    %23 = vector.load %arg0[%c0_7, %c0_8] : memref<32x32xf32, #tpu.memory_space<vmem>>, vector<32x32xf32>
    %cst = arith.constant dense<0.000000e+00> : vector<32x32xf32>
    %24 = tpu.matmul %23, %13, %cst {dimension_numbers = #tpu.dot_dimension_numbers<[1], [0], [0], [1], [0, 0, 1, 1], [], []>} : vector<32x32xf32>, vector<32x32xf32>, vector<32x32xf32> -> vector<32x32xf32>
    %cst_9 = arith.constant dense<0.000000e+00> : vector<32x32xf32>
    %25 = tpu.matmul %24, %22, %cst_9 {dimension_numbers = #tpu.dot_dimension_numbers<[1], [0], [0], [1], [0, 0, 1, 1], [], []>} : vector<32x32xf32>, vector<32x32xf32>, vector<32x32xf32> -> vector<32x32xf32>
    %c0_10 = arith.constant 0 : index
    %c0_11 = arith.constant 0 : index
    %26 = vector.load %arg5[%c0_10, %c0_11] : memref<32x32xf32, #tpu.memory_space<vmem>>, vector<32x32xf32>
    tpu.vector_store %arg5[%c0_10, %c0_11], %25 {strides = array<i32>} : memref<32x32xf32, #tpu.memory_space<vmem>>, vector<32x32xf32>,
    return
  }
}

</mosaic_0001>

<bundles_post_ra>
// kernel: tpu_custom_call.1
= control target key start
LH: loop header
LB: loop body
LE: loop exit
PB: predicated region body
PF: predicated region fallthrough
CT: control target
= control target key end

     0   :  { %10 = vsyncpa [#allocation3], 0  ;;  %s649_s0 = inlined_call_operand.hbm [shape: f32[32,32], index: 0, kind: input, shape index: {}]   ;;  %s650_s1 = inlined_call_operand.hbm [shape: f32[32,32], index: 1, kind: input, shape index: {}]   ;;  %s651_s2 = inlined_call_operand.hbm [shape: f32[32,32], index: 2, kind: input, shape index: {}]   ;;  %s652_s3 = inlined_call_operand.vmem [shape: f32[1,32], index: 3, kind: input, shape index: {}]   ;;  %s653_s4 = inlined_call_operand.vmem [shape: f32[1,32], index: 4, kind: input, shape index: {}]   ;;  %s654_s5 = inlined_call_operand.hbm [shape: f32[32,32], index: 5, kind: output, shape index: {}]  }
   0x1   :  { %11 = vsyncpa [#allocation6], 0 }
   0x2   :  { %12 = vsyncpa [#allocation4], 0  ;;  %s524_s18 = smov [#allocation5]   ;;  %s525_s20 = smov [#allocation2]  }
   0x3   :  { %s30_s19 = sshll.u32 %s524_s18, 4  ;;  %s18_s21 = sshll.u32 %s525_s20, 4  ;;  %s31_s19 = int_to_ptr.vmem [resolvable:$true] %s30_s19  ;;  %s19_s21 = int_to_ptr.vmem [resolvable:$true] %s18_s21 }
   0x4   :  { %s446_s22 = scalar_lea.vmem %s31_s19, 512  ;;  %p451_p1 = scmp.lt.s32.totalorder %s31_s19, %s31_s19 }
   0x5   :  { %p447_p0 = scmp.ne.s32.totalorder %s31_s19, %s446_s22  ;;  %p452_p2 = scmp.lt.s32.totalorder %s446_s22, %s446_s22 }
   0x7   :  { %p453_p3 = por %p452_p2, %p451_p1 }
   0x9   :  { %p454_p4 = pnand %p453_p3, %p447_p0 }
   0xb   :  { %457 = shalt.err (!%p454_p4)
}
   0xc   :  { %s526_s23 = smov 128   ;;  %s527_s24 = smov 8  }
   0xd   :  { %36 = dma.hbm_to_vmem [thread:$0]  %s650_s1, 512, %s31_s19, [#allocation6], %s526_s23, %s526_s23, %s527_s24  }
   0xe   :  { %s466_s27 = scalar_lea.vmem %s19_s21, 512  ;;  %p471_p6 = scmp.lt.s32.totalorder %s19_s21, %s19_s21 }
   0xf   :  { %p467_p5 = scmp.ne.s32.totalorder %s19_s21, %s466_s27  ;;  %p472_p7 = scmp.lt.s32.totalorder %s466_s27, %s466_s27 }
  0x11   :  { %p473_p8 = por %p472_p7, %p471_p6 }
  0x13   :  { %p474_p9 = pnand %p473_p8, %p467_p5 }
  0x15   :  { %477 = shalt.err (!%p474_p9)
}
  0x16   :  { %24 = dma.hbm_to_vmem [thread:$0]  %s649_s0, 512, %s19_s21, [#allocation3], %s526_s23, %s526_s23, %s527_s24  }
  0x17   :  { %s528_s30 = smov [#allocation7]  }
  0x18   :  { %s42_s6 = sshll.u32 %s528_s30, 4  ;;  %s43_s6 = int_to_ptr.vmem [resolvable:$true] %s42_s6 }
  0x19   :  { %s486_s7 = scalar_lea.vmem %s43_s6, 512  ;;  %p491_p11 = scmp.lt.s32.totalorder %s43_s6, %s43_s6 }
  0x1a   :  { %p487_p10 = scmp.ne.s32.totalorder %s43_s6, %s486_s7  ;;  %p492_p12 = scmp.lt.s32.totalorder %s486_s7, %s486_s7 }
  0x1c   :  { %p493_p13 = por %p492_p12, %p491_p11 }
  0x1e   :  { %p494_p0 = pnand %p493_p13, %p487_p10 }
  0x20   :  { %497 = shalt.err (!%p494_p0)
}
  0x21   :  { %48 = dma.hbm_to_vmem [thread:$0]  %s651_s2, 512, %s43_s6, [#allocation6], %s526_s23, %s526_s23, %s527_s24  }
  0x22   :  { %518 = dma.done.wait [#allocation3], 512  }
  0x23   :  { %519 = vsyncadd [#allocation3], 4294966784 }
  0x24   :  { %520 = dma.done.wait [#allocation6], 1024  }
  0x25   :  { %521 = vsyncadd [#allocation6], 4294966272  ;;  %v62_v0 = vlaneseq  ;;  %vm148_vm2 = vcmask 261120   ;;  %v529_v6 = vmov 0.0   ;;  %v108_v9 = vld [vmem:[#allocation5 + $0x18] sm:$0xff]  ;;  %v107_v12 = vld [vmem:[#allocation5 + $0x10] sm:$0xff] }
  0x26   :  { %v106_v15 = vld [vmem:[#allocation5 + $0x8] sm:$0xff]  ;;  %v105_v16 = vld [vmem:[#allocation5] sm:$0xff]  ;;  %v146_v31 = vld [vmem:[#allocation2 + $0x10] sm:$0xff] }
  0x27   :  { %v579_v1 = vshrl.u32 %v62_v0, 7  ;;  %v581_v2 = vand.u32 127, %v62_v0  ;;  %v144_v17 = vld [vmem:[#allocation2] sm:$0xff]  ;;  %v145_v30 = vld [vmem:[#allocation2 + $0x8] sm:$0xff]  ;;  %v147_v32 = vld [vmem:[#allocation2 + $0x18] sm:$0xff] }
  0x28   :  { %409 = vmatprep.mubr.msk.f32.mxu0 %vm148_vm2, %v144_v17  ;;  %v118_v25 = vld [vmem:[%s653_s4] sm:$0x1]  ;;  %v125_v37 = vld [vmem:[#allocation7 + $0x18] sm:$0xff]  ;;  %v124_v39 = vld [vmem:[#allocation7 + $0x10] sm:$0xff] }
  0x29   :  { %v66_v3 = vadd.s32 24, %v579_v1  ;;  %v65_v4 = vadd.s32 16, %v579_v1  ;;  %v586_v5 = vadd.s32 8, %v579_v1  ;;  %vm69_vm0 = vcmp.eq.s32.totalorder %v579_v1, %v581_v2  ;;  %v117_v33 = vld [vmem:[%s652_s3] sm:$0x1]  ;;  %v123_v49 = vld [vmem:[#allocation7 + $0x8] sm:$0xff] }
  0x2a   :  { %vm81_vm1 = vcmp.gt.s32.totalorder %v579_v1, %v581_v2  ;;  %v365_v26 = vsel %vm69_vm0, 1.0, %v529_v6  ;;  %v119_v27 = vmul.f32 1.442695, %v118_v25  ;;  %v133_v34 = vsub.s32 0, %v579_v1  ;;  %v122_v53 = vld [vmem:[#allocation7] sm:$0xff]  ;;  %s530_s3 = smov [#allocation8]  }
  0x2b   :  { %vm72_vm3 = vcmp.eq.s32.totalorder %v66_v3, %v581_v2  ;;  %vm84_vm4 = vcmp.gt.s32.totalorder %v66_v3, %v581_v2  ;;  %vm71_vm5 = vcmp.eq.s32.totalorder %v65_v4, %v581_v2  ;;  %vm83_vm6 = vcmp.gt.s32.totalorder %v65_v4, %v581_v2  ;;  %s352_s10 = sshll.u32 %s530_s3, 4  ;;  %s353_s10 = int_to_ptr.vmem [resolvable:$true] %s352_s10 }
  0x2c   :  { %v368_v7 = vsel %vm72_vm3, 1.0, %v529_v6  ;;  %v372_v8 = vsel %vm84_vm4, 1.0, %v529_v6  ;;  %v367_v10 = vsel %vm71_vm5, 1.0, %v529_v6  ;;  %v371_v11 = vsel %vm83_vm6, 1.0, %v529_v6  ;;  %s498_s11 = scalar_lea.vmem %s353_s10, 512  ;;  %p503_p2 = scmp.lt.s32.totalorder %s353_s10, %s353_s10 }
  0x2d   :  { %v112_v13 = vmul.f32 %v372_v8, %v108_v9  ;;  %v111_v14 = vmul.f32 %v371_v11, %v107_v12  ;;  %vm70_vm7 = vcmp.eq.s32.totalorder %v586_v5, %v581_v2  ;;  %vm82_vm8 = vcmp.gt.s32.totalorder %v586_v5, %v581_v2  ;;  %p499_p1 = scmp.ne.s32.totalorder %s353_s10, %s498_s11  ;;  %p504_p3 = scmp.lt.s32.totalorder %s498_s11, %s498_s11 }
  0x2e   :  { %v366_v18 = vsel %vm70_vm7, 1.0, %v529_v6  ;;  %v370_v19 = vsel %vm82_vm8, 1.0, %v529_v6  ;;  %v369_v20 = vsel %vm81_vm1, 1.0, %v529_v6  ;;  %436 = vpow2.f32 %v119_v27 }
  0x2f   :  { %v116_v21 = vadd.f32 %v368_v7, %v112_v13  ;;  %v115_v22 = vadd.f32 %v367_v10, %v111_v14  ;;  %v110_v23 = vmul.f32 %v370_v19, %v106_v15  ;;  %v109_v24 = vmul.f32 %v369_v20, %v105_v16  ;;  %p505_p4 = por %p504_p3, %p503_p2 }
  0x30   :  { %vm96_vm9 = vcmp.lt.s32.totalorder %v66_v3, %v581_v2  ;;  %vm95_vm10 = vcmp.lt.s32.totalorder %v65_v4, %v581_v2  ;;  %vm94_vm11 = vcmp.lt.s32.totalorder %v586_v5, %v581_v2  ;;  %vm93_vm12 = vcmp.lt.s32.totalorder %v579_v1, %v581_v2 }
  0x31   :  { %401 = vmatprep.subr.mxu0 %v116_v21  ;;  %v114_v28 = vadd.f32 %v366_v18, %v110_v23  ;;  %v113_v29 = vadd.f32 %v365_v26, %v109_v24  ;;  %v376_v36 = vsel %vm96_vm9, 1.0, %v529_v6  ;;  %v375_v38 = vsel %vm95_vm10, 1.0, %v529_v6  ;;  %p506_p5 = pnand %p505_p4, %p499_p1 }
  0x32   :  { %402 = vmatpush3.msra.mxu0 %v116_v21  ;;  %v129_v41 = vmul.f32 %v376_v36, %v125_v37  ;;  %v128_v43 = vmul.f32 %v375_v38, %v124_v39  ;;  %v374_v48 = vsel %vm94_vm11, 1.0, %v529_v6  ;;  %v373_v52 = vsel %vm93_vm12, 1.0, %v529_v6 }
  0x33   :  { %403 = vmatprep.subr.mxu0 %v115_v22  ;;  %v127_v50 = vmul.f32 %v374_v48, %v123_v49  ;;  %v126_v55 = vmul.f32 %v373_v52, %v122_v53 }
  0x34   :  { %404 = vmatpush3.msra.mxu0 %v115_v22 }
  0x35   :  { %405 = vmatprep.subr.mxu0 %v114_v28 }
  0x36   :  { %406 = vmatpush3.msra.mxu0 %v114_v28 }
  0x37   :  { %407 = vmatprep.subr.mxu0 %v113_v29 }
  0x38   :  { %408 = vmatpush3.msra.mxu0 %v113_v29 }
  0x39   :  { %410 = vmatmul.mubr.msk.f32.vlgmr.msra.gmra.mxu0 %vm148_vm2, %v145_v30 }
  0x3a   :  { %412 = vmatprep.mubr.msk.f32.mxu0 %vm148_vm2, %v146_v31 }
  0x3b   :  { %v437_v35 = vpop.eup %436 }
  0x3c   :  { %v121_v40 = vmul.f32 %v437_v35, %v117_v33 }
  0x3d   :  { %413 = vmatmul.mubr.msk.f32.gmra.mxu0 %vm148_vm2, %v147_v32 }
  0x3e   :  { %v134_v42 = vrot.slane %v121_v40, %v133_v34 }
  0x40   :  { %v139_v44 = vmul.f32 %v368_v7, %v134_v42  ;;  %v138_v45 = vmul.f32 %v367_v10, %v134_v42  ;;  %v137_v51 = vmul.f32 %v366_v18, %v134_v42  ;;  %v136_v56 = vmul.f32 %v365_v26, %v134_v42 }
  0x42   :  { %v143_v46 = vadd.f32 %v139_v44, %v129_v41  ;;  %v142_v47 = vadd.f32 %v138_v45, %v128_v43  ;;  %v141_v54 = vadd.f32 %v137_v51, %v127_v50  ;;  %v140_v57 = vadd.f32 %v136_v56, %v126_v55 }
  0x44   :  { %415 = vmatprep.subr.mxu1 %v143_v46 }
  0x45   :  { %416 = vmatpush3.msra.mxu1 %v143_v46 }
  0x46   :  { %417 = vmatprep.subr.mxu1 %v142_v47 }
  0x47   :  { %418 = vmatpush3.msra.mxu1 %v142_v47 }
  0x48   :  { %419 = vmatprep.subr.mxu1 %v141_v54 }
  0x49   :  { %420 = vmatpush3.msra.mxu1 %v141_v54 }
  0x4a   :  { %421 = vmatprep.subr.mxu1 %v140_v57 }
  0x4b   :  { %422 = vmatpush3.msra.mxu1 %v140_v57 }
  0xf9   :  { %v411_v58 = vpop.f32.mrf.mxu0 }
  0xfb   :  { %v227_v59 = vpop.f32.mrf.mxu0 }
  0xfc   :  { %423 = vmatprep.mubr.msk.f32.mxu1 %vm148_vm2, %v227_v59 }
  0xfd   :  { %v414_v60 = vpop.f32.mrf.mxu0  ;;  %424 = vmatmul.mubr.msk.f32.vlgmr.msra.gmra.mxu1 %vm148_vm2, %v411_v58 }
  0xff   :  { %v237_v61 = vpop.f32.mrf.mxu0 }
 0x100   :  { %426 = vmatprep.mubr.msk.f32.mxu1 %vm148_vm2, %v237_v61 }
 0x101   :  { %427 = vmatmul.mubr.msk.f32.gmra.mxu1 %vm148_vm2, %v414_v60 }
 0x1bd   :  { %v425_v62 = vpop.f32.mrf.mxu1 }
 0x1be   :  { %344 = vst.msk [vmem:[#allocation8 + $0x8] sm:$0xff] %vm148_vm2, %v425_v62 }
 0x1bf   :  { %v324_v63 = vpop.f32.mrf.mxu1 }
 0x1c0   :  { %343 = vst.msk [vmem:[#allocation8] sm:$0xff] %vm148_vm2, %v324_v63 }
 0x1c1   :  { %v428_v0 = vpop.f32.mrf.mxu1 }
 0x1c2   :  { %346 = vst.msk [vmem:[#allocation8 + $0x18] sm:$0xff] %vm148_vm2, %v428_v0 }
 0x1c3   :  { %v334_v1 = vpop.f32.mrf.mxu1 }
 0x1c4   :  { %345 = vst.msk [vmem:[#allocation8 + $0x10] sm:$0xff] %vm148_vm2, %v334_v1 }
 0x1c5   :  { %509 = shalt.err (!%p506_p5)
}
 0x1c6   :  { %358 = dma.vmem_to_hbm [thread:$0]  %s353_s10, 512, %s654_s5, [#allocation4], %s526_s23, %s526_s23, %s527_s24  }
 0x1c7   :  { %522 = dma.done.wait [#allocation4], 512  }
 0x1c8   :  { %523 = vsyncadd [#allocation4], 4294966784 }
 0x1c9   :  { %362 = vsyncpa [#allocation3], 1 }
 0x1ca   :  { %363 = vsyncpa [#allocation6], 1 }
 0x1cb   :  { %364 = vsyncpa [#allocation4], 1 }

</bundles_post_ra>
